<compile_context>
chip_gen: v7x
topology: tpu7x:2x2x1
jax: 0.10.0
libtpu: 0.0.40
codegen_flags: <defaults>
</compile_context>

<pallas_src>
import numpy as np
import jax
import jax.numpy as jnp
from jax.experimental import pallas as pl
from jax.experimental.pallas import tpu as pltpu


def _round_up(x, m):
    return (x + m - 1) // m * m


def _pack_pad(parts, width):
    """Concatenate parts along lanes and zero-pad to `width` (static)."""
    x = jnp.concatenate(parts, axis=-1)
    pad = width - x.shape[-1]
    if pad:
        x = jnp.concatenate([x, jnp.zeros((x.shape[0], pad), x.dtype)], axis=-1)
    return x


# ----------------------------------------------------------------------------
# Pallas kernel: one full decoder step for a batch tile.
#   emb   (bt, E)  f32 | ctx (bt, H) f32 | h (bt, H) f32 | c (bt, H) f32
#   enc   (bt, S, H) bf16 | mask (bt, S) f32
#   w_e (E,4H) bf16, w_c (H,4H) bf16, w_h (H,4H) bf16, b_lstm (1,4H) f32
#   w_attn (H,H) bf16 (PyTorch (out,in)); w_oc/w_oh (H,Vp) bf16, b_out (1,Vp) f32
# Outputs (all lane-dense, padded to multiples of 128 lanes):
#   logits (bt, Vp) | hc = [h|c|pad] (bt, HC) | ctx_attn = [context|attn_w|pad] (bt, CA)
# ----------------------------------------------------------------------------
def _decoder_step_kernel(emb_ref, ctx_ref, h_ref, c_ref, enc_ref, mask_ref,
                         w_e_ref, w_c_ref, w_h_ref, b_lstm_ref,
                         w_attn_ref, w_oc_ref, w_oh_ref, b_out_ref,
                         logits_ref, hc_ref, ctx_attn_ref):
    H = h_ref.shape[-1]
    f32 = jnp.float32
    bf16 = jnp.bfloat16

    # ---- LSTM cell: accumulated bf16 MXU matmuls (no lane concat) ----
    gates = (jnp.dot(emb_ref[...].astype(bf16), w_e_ref[...],
                     preferred_element_type=f32)
             + jnp.dot(ctx_ref[...].astype(bf16), w_c_ref[...],
                       preferred_element_type=f32)
             + jnp.dot(h_ref[...].astype(bf16), w_h_ref[...],
                       preferred_element_type=f32)
             + b_lstm_ref[...])

    # sigmoid via tanh: one EUP op per element instead of exp + divide.
    sig = lambda x: 0.5 * (jnp.tanh(0.5 * x) + 1.0)
    i_g = sig(gates[:, 0 * H:1 * H])
    f_g = sig(gates[:, 1 * H:2 * H])
    g_g = jnp.tanh(gates[:, 2 * H:3 * H])
    o_g = sig(gates[:, 3 * H:4 * H])
    c_new = f_g * c_ref[...] + i_g * g_g
    h_new = o_g * jnp.tanh(c_new)

    # ---- attention, method='general' (bias dropped: constant over s) ----
    # PyTorch: e[b,s] = (enc[b,s,:] @ A.T + b_a) . h[b,:]
    # rewrite: e[b,s] = enc[b,s,:] . (h[b,:] @ A)   [+ const -> cancels in softmax]
    enc_f = enc_ref[...].astype(f32)                                       # (bt,S,H) once
    q = jnp.dot(h_new.astype(bf16), w_attn_ref[...],
                preferred_element_type=f32)                                # (bt,H)
    energies = jnp.sum(enc_f * q[:, None, :], axis=-1)                     # (bt,S)
    # all-zero-mask rows give uniform softmax (all energies equal) - no NaNs.
    energies = jnp.where(mask_ref[...] > 0, energies, -1e10)
    m = jnp.max(energies, axis=-1, keepdims=True)
    e = jnp.exp(energies - m)
    inv = pl.reciprocal(jnp.sum(e, axis=-1, keepdims=True), approx=True)
    attn_w = e * inv                                                       # (bt,S)

    # ---- context + output projection (accumulated matmuls, padded lanes) ----
    context = jnp.sum(attn_w[:, :, None] * enc_f, axis=1)                  # (bt,H)
    logits_ref[...] = (jnp.dot(context.astype(bf16), w_oc_ref[...],
                               preferred_element_type=f32)
                       + jnp.dot(h_new.astype(bf16), w_oh_ref[...],
                                 preferred_element_type=f32)
                       + b_out_ref[...])
    # lane-dense packed writebacks (single unmasked store each)
    hc_ref[...] = _pack_pad([h_new, c_new], hc_ref.shape[-1])
    ctx_attn_ref[...] = _pack_pad([context, attn_w], ctx_attn_ref.shape[-1])


# ----------------------------------------------------------------------------
# Wrapper: PyTorch AttentionDecoder.forward signature / shapes.
# ----------------------------------------------------------------------------
def attention_decoder_forward(params, input_tok, last_hidden, last_context,
                              encoder_outputs, mask):
    """input_tok (B,1) int32; last_hidden = (h,c) each (1,B,H);
    last_context (B,1,H); encoder_outputs (B,S,H); mask (B,S).
    Returns (logits (B,V), (h_n, c_n), context (B,1,H), attn_weights (B,S))."""
    B, S, H = encoder_outputs.shape
    E = params["w_ih_e"].shape[0]
    Vp = params["b_out"].shape[-1]
    V = params["vocab_size"]
    HC = _round_up(2 * H, 128)
    CA = _round_up(H + S, 128)

    h_prev = last_hidden[0][0].astype(jnp.float32)            # (B, H)
    c_prev = last_hidden[1][0].astype(jnp.float32)
    ctx_prev = last_context[:, 0, :].astype(jnp.float32)      # (B, H)

    # glue: embedding gather stays in XLA (dropout = identity in eval mode)
    emb = jnp.take(params["embedding"], input_tok[:, 0], axis=0).astype(jnp.float32)

    enc = encoder_outputs.astype(jnp.bfloat16)                 # stream bf16 (bytes/2)
    mask_f = mask.astype(jnp.float32)

    # batch tiling: whole batch in one tile when small (MXU is overhead-bound
    # anyway); large batches use 128/256-row tiles so v7x's two TensorCores
    # both get grid iterations via the "parallel" axis.
    if B % 256 == 0 and B >= 512:
        bt = 256
    elif B % 128 == 0 and B >= 256:
        bt = 128
    else:
        bt = B
    grid = (B // bt,)

    row = lambda i: (i, 0)
    full2 = lambda i: (0, 0)
    in_specs = [
        pl.BlockSpec((bt, E), row),                      # emb
        pl.BlockSpec((bt, H), row),                      # last_context
        pl.BlockSpec((bt, H), row),                      # h_prev
        pl.BlockSpec((bt, H), row),                      # c_prev
        pl.BlockSpec((bt, S, H), lambda i: (i, 0, 0)),   # encoder_outputs (bf16)
        pl.BlockSpec((bt, S), row),                      # mask
        pl.BlockSpec((E, 4 * H), full2),                 # W_ih rows for emb
        pl.BlockSpec((H, 4 * H), full2),                 # W_ih rows for context
        pl.BlockSpec((H, 4 * H), full2),                 # W_hh
        pl.BlockSpec((1, 4 * H), full2),                 # b_ih + b_hh
        pl.BlockSpec((H, H), full2),                     # attn weight
        pl.BlockSpec((H, Vp), full2),                    # out weight rows for context
        pl.BlockSpec((H, Vp), full2),                    # out weight rows for h
        pl.BlockSpec((1, Vp), full2),                    # out bias (padded)
    ]
    out_specs = (
        pl.BlockSpec((bt, Vp), row),
        pl.BlockSpec((bt, HC), row),
        pl.BlockSpec((bt, CA), row),
    )
    out_shape = (
        jax.ShapeDtypeStruct((B, Vp), jnp.float32),
        jax.ShapeDtypeStruct((B, HC), jnp.float32),
        jax.ShapeDtypeStruct((B, CA), jnp.float32),
    )

    logits_p, hc, ctx_attn = pl.pallas_call(
        _decoder_step_kernel,
        out_shape=out_shape,
        grid_spec=pltpu.PrefetchScalarGridSpec(
            num_scalar_prefetch=0, grid=grid,
            in_specs=in_specs, out_specs=out_specs),
        compiler_params=pltpu.CompilerParams(
            dimension_semantics=("parallel",),
            # > scoped defaults (16/32 MiB), <= v7x's 64 MiB physical VMEM.
            vmem_limit_bytes=48 * 1024 * 1024),
    )(emb, ctx_prev, h_prev, c_prev, enc, mask_f,
      params["w_ih_e"], params["w_ih_c"], params["w_hh"], params["b_lstm"],
      params["w_attn"], params["w_out_c"], params["w_out_h"], params["b_out"])

    logits = logits_p[:, :V]
    h_n = hc[:, :H][None]                      # (1, B, H)
    c_n = hc[:, H:2 * H][None]                 # (1, B, H)
    context = ctx_attn[:, :H][:, None, :]      # (B, 1, H)
    attn_weights = ctx_attn[:, H:H + S]        # (B, S)
    return logits, (h_n, c_n), context, attn_weights


# ----------------------------------------------------------------------------
# Plain-JAX reference of the PyTorch math (validates the in-kernel fusions).
# bf16 quantization is applied at the same operand interfaces as the kernel so
# the remaining deviation is summation order + approx reciprocal only.
# ----------------------------------------------------------------------------
def _reference_forward(params, input_tok, last_hidden, last_context,
                       encoder_outputs, mask):
    hp = jax.lax.Precision.HIGHEST
    f32 = jnp.float32
    r = lambda x: x.astype(jnp.bfloat16).astype(f32)   # same rounding as kernel
    B, S, H = encoder_outputs.shape
    V = params["vocab_size"]

    emb = jnp.take(params["embedding"], input_tok[:, 0], axis=0)
    h_prev, c_prev = last_hidden[0][0], last_hidden[1][0]
    ctx_prev = last_context[:, 0, :]

    # LSTM (PyTorch structure: rnn_input = cat(emb, context))
    w_ih = jnp.concatenate([params["w_ih_e"], params["w_ih_c"]], 0).astype(f32)
    w_hh = params["w_hh"].astype(f32)
    rnn_in = jnp.concatenate([emb, ctx_prev], axis=-1)
    gates = (jnp.dot(r(rnn_in), w_ih, precision=hp)
             + jnp.dot(r(h_prev), w_hh, precision=hp) + params["b_lstm"])
    i_g = jax.nn.sigmoid(gates[:, :H])
    f_g = jax.nn.sigmoid(gates[:, H:2 * H])
    g_g = jnp.tanh(gates[:, 2 * H:3 * H])
    o_g = jax.nn.sigmoid(gates[:, 3 * H:])
    c_new = f_g * c_prev + i_g * g_g
    h_new = o_g * jnp.tanh(c_new)

    # Attn 'general' with bias (bias is constant over s -> cancels in softmax)
    enc_q = r(encoder_outputs)
    w_attn = params["w_attn"].astype(f32)
    proj = (jnp.dot(enc_q.reshape(-1, H), w_attn.T, precision=hp)
            + params["b_attn"]).reshape(B, S, H)
    energies = jnp.einsum("bsh,bh->bs", proj, r(h_new), precision=hp)
    energies = jnp.where(mask == 0, -1e10, energies)
    attn_w = jax.nn.softmax(energies, axis=1)
    context = jnp.einsum("bs,bsh->bh", attn_w, enc_q, precision=hp)

    w_out = jnp.concatenate([params["w_out_c"], params["w_out_h"]],
                            axis=0).astype(f32)[:, :V]
    b_out = params["b_out"][:, :V]
    out_cat = jnp.concatenate([r(context), r(h_new)], axis=-1)
    logits = jnp.dot(out_cat, w_out, precision=hp) + b_out
    return logits, (h_new[None], c_new[None]), context[:, None, :], attn_w


# ----------------------------------------------------------------------------
# Deterministic parameters (PyTorch layouts, pre-split/padded/bf16 for kernel)
# ----------------------------------------------------------------------------
def make_params(key, vocabulary_size, embedding_size, hidden_size):
    H, E, V = hidden_size, embedding_size, vocabulary_size
    Vp = _round_up(V, 128)
    ks = jax.random.split(key, 9)
    scale = 1.0 / np.sqrt(H)

    def u(k, shape):
        return jax.random.uniform(k, shape, jnp.float32, -scale, scale)

    w_ih = u(ks[1], (E + H, 4 * H))   # weight_ih_l0.T  (input = emb ++ context)
    w_hh = u(ks[2], (H, 4 * H))       # weight_hh_l0.T
    w_out = u(ks[7], (2 * H, V))      # linear.weight.T (input = context ++ h)
    b_out = u(ks[8], (1, V))

    pad_cols = lambda a: jnp.pad(a, ((0, 0), (0, Vp - V)))
    bf = lambda a: a.astype(jnp.bfloat16)

    return {
        "vocab_size": V,
        "embedding": jax.random.normal(ks[0], (V, E), jnp.float32),
        "w_ih_e": bf(w_ih[:E]),                                 # (E, 4H) bf16
        "w_ih_c": bf(w_ih[E:]),                                 # (H, 4H) bf16
        "w_hh": bf(w_hh),                                       # (H, 4H) bf16
        "b_lstm": u(ks[3], (1, 4 * H)) + u(ks[4], (1, 4 * H)),  # b_ih + b_hh
        "w_attn": bf(u(ks[5], (H, H))),                         # (out, in) bf16
        "b_attn": u(ks[6], (1, H)),                             # reference only
        "w_out_c": bf(pad_cols(w_out[:H])),                     # (H, Vp) bf16
        "w_out_h": bf(pad_cols(w_out[H:])),                     # (H, Vp) bf16
        "b_out": pad_cols(b_out),                               # (1, Vp) f32
    }


if __name__ == "__main__":
    VOCAB = 40
    EMB = 32
    HIDDEN = 64      # 2H = 128 -> lane-dense packed state output
    B, S = 4, 8

    key = jax.random.PRNGKey(0)
    k_tok, k_par, k_enc, k_h, k_c, k_ctx = jax.random.split(key, 6)
    params = make_params(k_par, VOCAB, EMB, HIDDEN)

    input_tok = jax.random.randint(k_tok, (B, 1), 1, VOCAB, dtype=jnp.int32)
    encoder_outputs = jax.random.normal(k_enc, (B, S, HIDDEN), jnp.float32) * 0.5
    h0 = jax.random.normal(k_h, (1, B, HIDDEN), jnp.float32) * 0.1
    c0 = jax.random.normal(k_c, (1, B, HIDDEN), jnp.float32) * 0.1
    last_context = jax.random.normal(k_ctx, (B, 1, HIDDEN), jnp.float32) * 0.1
    lengths = jnp.array([8, 5, 7, 3], jnp.int32)
    mask = (jnp.arange(S)[None, :] < lengths[:, None]).astype(jnp.float32)

    out = attention_decoder_forward(params, input_tok, (h0, c0),
                                    last_context, encoder_outputs, mask)
    logits, (h_n, c_n), context, attn_w = out
    jax.block_until_ready(out)

    assert logits.shape == (B, VOCAB)
    assert h_n.shape == (1, B, HIDDEN) and c_n.shape == (1, B, HIDDEN)
    assert context.shape == (B, 1, HIDDEN)
    assert attn_w.shape == (B, S)

    ref = _reference_forward(params, input_tok, (h0, c0),
                             last_context, encoder_outputs, mask)
    r_logits, (r_h, r_c), r_ctx, r_attn = ref
    # 1e-2 tolerance: bf16-streamed operands + approx-reciprocal softmax norm.
    for got, want, name in [(logits, r_logits, "logits"), (h_n, r_h, "h_n"),
                            (c_n, r_c, "c_n"), (context, r_ctx, "context"),
                            (attn_w, r_attn, "attn_weights")]:
        np.testing.assert_allclose(np.asarray(got), np.asarray(want),
                                   rtol=1e-2, atol=1e-2, err_msg=name)

    print("KERNEL_OK")
</pallas_src>

<mosaic_0001>
module attributes {stable_mosaic.version = 11 : i64} {
  func.func @_decoder_step_kernel(%arg0: i32, %arg1: memref<4x32xf32, #tpu.memory_space<vmem>>, %arg2: memref<4x64xf32, #tpu.memory_space<vmem>>, %arg3: memref<4x64xf32, #tpu.memory_space<vmem>>, %arg4: memref<4x64xf32, #tpu.memory_space<vmem>>, %arg5: memref<4x8x64xbf16, #tpu.memory_space<vmem>>, %arg6: memref<4x8xf32, #tpu.memory_space<vmem>>, %arg7: memref<32x256xbf16, #tpu.memory_space<vmem>>, %arg8: memref<64x256xbf16, #tpu.memory_space<vmem>>, %arg9: memref<64x256xbf16, #tpu.memory_space<vmem>>, %arg10: memref<1x256xf32, #tpu.memory_space<vmem>>, %arg11: memref<64x64xbf16, #tpu.memory_space<vmem>>, %arg12: memref<64x128xbf16, #tpu.memory_space<vmem>>, %arg13: memref<64x128xbf16, #tpu.memory_space<vmem>>, %arg14: memref<1x128xf32, #tpu.memory_space<vmem>>, %arg15: memref<4x128xf32, #tpu.memory_space<vmem>>, %arg16: memref<4x128xf32, #tpu.memory_space<vmem>>, %arg17: memref<4x128xf32, #tpu.memory_space<vmem>>) attributes {dimension_semantics = [#tpu.dimension_semantics<parallel>], iteration_bounds = array<i64: 1>, scalar_prefetch = 0 : i64, scratch_operands = 0 : i64, tpu.core_type = #tpu.core_type<tc>, window_params = [{transform_indices = @transform_0, window_bounds = array<i64: 4, 32>}, {transform_indices = @transform_1, window_bounds = array<i64: 4, 64>}, {transform_indices = @transform_2, window_bounds = array<i64: 4, 64>}, {transform_indices = @transform_3, window_bounds = array<i64: 4, 64>}, {transform_indices = @transform_4, window_bounds = array<i64: 4, 8, 64>}, {transform_indices = @transform_5, window_bounds = array<i64: 4, 8>}, {pipeline_mode = #tpu.pipeline_mode<synchronous>, transform_indices = @transform_6, window_bounds = array<i64: 32, 256>}, {pipeline_mode = #tpu.pipeline_mode<synchronous>, transform_indices = @transform_7, window_bounds = array<i64: 64, 256>}, {pipeline_mode = #tpu.pipeline_mode<synchronous>, transform_indices = @transform_8, window_bounds = array<i64: 64, 256>}, {pipeline_mode = #tpu.pipeline_mode<synchronous>, transform_indices = @transform_9, window_bounds = array<i64: 1, 256>}, {pipeline_mode = #tpu.pipeline_mode<synchronous>, transform_indices = @transform_10, window_bounds = array<i64: 64, 64>}, {pipeline_mode = #tpu.pipeline_mode<synchronous>, transform_indices = @transform_11, window_bounds = array<i64: 64, 128>}, {pipeline_mode = #tpu.pipeline_mode<synchronous>, transform_indices = @transform_12, window_bounds = array<i64: 64, 128>}, {pipeline_mode = #tpu.pipeline_mode<synchronous>, transform_indices = @transform_13, window_bounds = array<i64: 1, 128>}, {transform_indices = @transform_14, window_bounds = array<i64: 4, 128>}, {transform_indices = @transform_15, window_bounds = array<i64: 4, 128>}, {transform_indices = @transform_16, window_bounds = array<i64: 4, 128>}]} {
    %c0 = arith.constant 0 : index
    %c0_0 = arith.constant 0 : index
    %0 = vector.load %arg1[%c0, %c0_0] : memref<4x32xf32, #tpu.memory_space<vmem>>, vector<4x32xf32>
    %1 = arith.truncf %0 : vector<4x32xf32> to vector<4x32xbf16>
    %c0_1 = arith.constant 0 : index
    %c0_2 = arith.constant 0 : index
    %2 = vector.load %arg7[%c0_1, %c0_2] : memref<32x256xbf16, #tpu.memory_space<vmem>>, vector<32x256xbf16>
    %cst = arith.constant dense<0.000000e+00> : vector<4x256xf32>
    %3 = tpu.matmul %1, %2, %cst {dimension_numbers = #tpu.dot_dimension_numbers<[1], [0], [0], [1], [0, 0, 1, 1], [], []>} : vector<4x32xbf16>, vector<32x256xbf16>, vector<4x256xf32> -> vector<4x256xf32>
    %c0_3 = arith.constant 0 : index
    %c0_4 = arith.constant 0 : index
    %4 = vector.load %arg2[%c0_3, %c0_4] : memref<4x64xf32, #tpu.memory_space<vmem>>, vector<4x64xf32>
    %5 = arith.truncf %4 : vector<4x64xf32> to vector<4x64xbf16>
    %c0_5 = arith.constant 0 : index
    %c0_6 = arith.constant 0 : index
    %6 = vector.load %arg8[%c0_5, %c0_6] : memref<64x256xbf16, #tpu.memory_space<vmem>>, vector<64x256xbf16>
    %cst_7 = arith.constant dense<0.000000e+00> : vector<4x256xf32>
    %7 = tpu.matmul %5, %6, %cst_7 {dimension_numbers = #tpu.dot_dimension_numbers<[1], [0], [0], [1], [0, 0, 1, 1], [], []>} : vector<4x64xbf16>, vector<64x256xbf16>, vector<4x256xf32> -> vector<4x256xf32>
    %8 = arith.addf %3, %7 : vector<4x256xf32>
    %c0_8 = arith.constant 0 : index
    %c0_9 = arith.constant 0 : index
    %9 = vector.load %arg3[%c0_8, %c0_9] : memref<4x64xf32, #tpu.memory_space<vmem>>, vector<4x64xf32>
    %10 = arith.truncf %9 : vector<4x64xf32> to vector<4x64xbf16>
    %c0_10 = arith.constant 0 : index
    %c0_11 = arith.constant 0 : index
    %11 = vector.load %arg9[%c0_10, %c0_11] : memref<64x256xbf16, #tpu.memory_space<vmem>>, vector<64x256xbf16>
    %cst_12 = arith.constant dense<0.000000e+00> : vector<4x256xf32>
    %12 = tpu.matmul %10, %11, %cst_12 {dimension_numbers = #tpu.dot_dimension_numbers<[1], [0], [0], [1], [0, 0, 1, 1], [], []>} : vector<4x64xbf16>, vector<64x256xbf16>, vector<4x256xf32> -> vector<4x256xf32>
    %13 = arith.addf %8, %12 : vector<4x256xf32>
    %c0_13 = arith.constant 0 : index
    %c0_14 = arith.constant 0 : index
    %14 = vector.load %arg10[%c0_13, %c0_14] : memref<1x256xf32, #tpu.memory_space<vmem>>, vector<1x256xf32>
    %15 = vector.broadcast %14 : vector<1x256xf32> to vector<4x256xf32>
    %16 = arith.addf %13, %15 : vector<4x256xf32>
    %17 = vector.extract_strided_slice %16 {offsets = [0, 0], sizes = [4, 64], strides = [1, 1]} : vector<4x256xf32> to vector<4x64xf32>
    %cst_15 = arith.constant 5.000000e-01 : f32
    %18 = vector.broadcast %cst_15 : f32 to vector<4x64xf32>
    %19 = arith.mulf %18, %17 : vector<4x64xf32>
    %20 = math.tanh %19 : vector<4x64xf32>
    %cst_16 = arith.constant 1.000000e+00 : f32
    %21 = vector.broadcast %cst_16 : f32 to vector<4x64xf32>
    %22 = arith.addf %20, %21 : vector<4x64xf32>
    %cst_17 = arith.constant 5.000000e-01 : f32
    %23 = vector.broadcast %cst_17 : f32 to vector<4x64xf32>
    %24 = arith.mulf %23, %22 : vector<4x64xf32>
    %25 = vector.extract_strided_slice %16 {offsets = [0, 64], sizes = [4, 64], strides = [1, 1]} : vector<4x256xf32> to vector<4x64xf32>
    %cst_18 = arith.constant 5.000000e-01 : f32
    %26 = vector.broadcast %cst_18 : f32 to vector<4x64xf32>
    %27 = arith.mulf %26, %25 : vector<4x64xf32>
    %28 = math.tanh %27 : vector<4x64xf32>
    %cst_19 = arith.constant 1.000000e+00 : f32
    %29 = vector.broadcast %cst_19 : f32 to vector<4x64xf32>
    %30 = arith.addf %28, %29 : vector<4x64xf32>
    %cst_20 = arith.constant 5.000000e-01 : f32
    %31 = vector.broadcast %cst_20 : f32 to vector<4x64xf32>
    %32 = arith.mulf %31, %30 : vector<4x64xf32>
    %33 = vector.extract_strided_slice %16 {offsets = [0, 128], sizes = [4, 64], strides = [1, 1]} : vector<4x256xf32> to vector<4x64xf32>
    %34 = math.tanh %33 : vector<4x64xf32>
    %35 = vector.extract_strided_slice %16 {offsets = [0, 192], sizes = [4, 64], strides = [1, 1]} : vector<4x256xf32> to vector<4x64xf32>
    %cst_21 = arith.constant 5.000000e-01 : f32
    %36 = vector.broadcast %cst_21 : f32 to vector<4x64xf32>
    %37 = arith.mulf %36, %35 : vector<4x64xf32>
    %38 = math.tanh %37 : vector<4x64xf32>
    %cst_22 = arith.constant 1.000000e+00 : f32
    %39 = vector.broadcast %cst_22 : f32 to vector<4x64xf32>
    %40 = arith.addf %38, %39 : vector<4x64xf32>
    %cst_23 = arith.constant 5.000000e-01 : f32
    %41 = vector.broadcast %cst_23 : f32 to vector<4x64xf32>
    %42 = arith.mulf %41, %40 : vector<4x64xf32>
    %c0_24 = arith.constant 0 : index
    %c0_25 = arith.constant 0 : index
    %43 = vector.load %arg4[%c0_24, %c0_25] : memref<4x64xf32, #tpu.memory_space<vmem>>, vector<4x64xf32>
    %44 = arith.mulf %32, %43 : vector<4x64xf32>
    %45 = arith.mulf %24, %34 : vector<4x64xf32>
    %46 = arith.addf %44, %45 : vector<4x64xf32>
    %47 = math.tanh %46 : vector<4x64xf32>
    %48 = arith.mulf %42, %47 : vector<4x64xf32>
    %c0_26 = arith.constant 0 : index
    %c0_27 = arith.constant 0 : index
    %c0_28 = arith.constant 0 : index
    %49 = vector.load %arg5[%c0_26, %c0_27, %c0_28] : memref<4x8x64xbf16, #tpu.memory_space<vmem>>, vector<4x8x64xbf16>
    %50 = arith.extf %49 : vector<4x8x64xbf16> to vector<4x8x64xf32>
    %51 = arith.truncf %48 : vector<4x64xf32> to vector<4x64xbf16>
    %c0_29 = arith.constant 0 : index
    %c0_30 = arith.constant 0 : index
    %52 = vector.load %arg11[%c0_29, %c0_30] : memref<64x64xbf16, #tpu.memory_space<vmem>>, vector<64x64xbf16>
    %cst_31 = arith.constant dense<0.000000e+00> : vector<4x64xf32>
    %53 = tpu.matmul %51, %52, %cst_31 {dimension_numbers = #tpu.dot_dimension_numbers<[1], [0], [0], [1], [0, 0, 1, 1], [], []>} : vector<4x64xbf16>, vector<64x64xbf16>, vector<4x64xf32> -> vector<4x64xf32>
    %54 = vector.shape_cast %53 : vector<4x64xf32> to vector<4x1x64xf32>
    %55 = vector.broadcast %54 : vector<4x1x64xf32> to vector<4x8x64xf32>
    %56 = arith.mulf %50, %55 : vector<4x8x64xf32>
    %cst_32 = arith.constant dense<0.000000e+00> : vector<4x8xf32>
    %57 = vector.multi_reduction <add>, %56, %cst_32 [2] : vector<4x8x64xf32> to vector<4x8xf32>
    %c0_33 = arith.constant 0 : index
    %c0_34 = arith.constant 0 : index
    %58 = vector.load %arg6[%c0_33, %c0_34] : memref<4x8xf32, #tpu.memory_space<vmem>>, vector<4x8xf32>
    %cst_35 = arith.constant 0.000000e+00 : f32
    %59 = vector.broadcast %cst_35 : f32 to vector<4x8xf32>
    %60 = arith.cmpf ogt, %58, %59 : vector<4x8xf32>
    %cst_36 = arith.constant -1.000000e+10 : f32
    %61 = vector.broadcast %cst_36 : f32 to vector<4x8xf32>
    %62 = arith.select %60, %57, %61 : vector<4x8xi1>, vector<4x8xf32>
    %cst_37 = arith.constant dense<0xFF800000> : vector<4xf32>
    %63 = vector.multi_reduction <maximumf>, %62, %cst_37 [1] : vector<4x8xf32> to vector<4xf32>
    %64 = vector.shape_cast %63 : vector<4xf32> to vector<4x1xf32>
    %65 = vector.broadcast %64 : vector<4x1xf32> to vector<4x8xf32>
    %66 = arith.subf %62, %65 : vector<4x8xf32>
    %67 = math.exp %66 : vector<4x8xf32>
    %cst_38 = arith.constant dense<0.000000e+00> : vector<4xf32>
    %68 = vector.multi_reduction <add>, %67, %cst_38 [1] : vector<4x8xf32> to vector<4xf32>
    %69 = vector.shape_cast %68 : vector<4xf32> to vector<4x1xf32>
    %70 = tpu.reciprocal %69 {approx = true} : vector<4x1xf32> -> vector<4x1xf32>
    %71 = vector.broadcast %70 : vector<4x1xf32> to vector<4x8xf32>
    %72 = arith.mulf %67, %71 : vector<4x8xf32>
    %73 = vector.shape_cast %72 : vector<4x8xf32> to vector<4x8x1xf32>
    %74 = vector.broadcast %73 : vector<4x8x1xf32> to vector<4x8x64xf32>
    %75 = arith.mulf %74, %50 : vector<4x8x64xf32>
    %cst_39 = arith.constant dense<0.000000e+00> : vector<4x64xf32>
    %76 = vector.multi_reduction <add>, %75, %cst_39 [1] : vector<4x8x64xf32> to vector<4x64xf32>
    %77 = arith.truncf %76 : vector<4x64xf32> to vector<4x64xbf16>
    %c0_40 = arith.constant 0 : index
    %c0_41 = arith.constant 0 : index
    %78 = vector.load %arg12[%c0_40, %c0_41] : memref<64x128xbf16, #tpu.memory_space<vmem>>, vector<64x128xbf16>
    %cst_42 = arith.constant dense<0.000000e+00> : vector<4x128xf32>
    %79 = tpu.matmul %77, %78, %cst_42 {dimension_numbers = #tpu.dot_dimension_numbers<[1], [0], [0], [1], [0, 0, 1, 1], [], []>} : vector<4x64xbf16>, vector<64x128xbf16>, vector<4x128xf32> -> vector<4x128xf32>
    %80 = arith.truncf %48 : vector<4x64xf32> to vector<4x64xbf16>
    %c0_43 = arith.constant 0 : index
    %c0_44 = arith.constant 0 : index
    %81 = vector.load %arg13[%c0_43, %c0_44] : memref<64x128xbf16, #tpu.memory_space<vmem>>, vector<64x128xbf16>
    %cst_45 = arith.constant dense<0.000000e+00> : vector<4x128xf32>
    %82 = tpu.matmul %80, %81, %cst_45 {dimension_numbers = #tpu.dot_dimension_numbers<[1], [0], [0], [1], [0, 0, 1, 1], [], []>} : vector<4x64xbf16>, vector<64x128xbf16>, vector<4x128xf32> -> vector<4x128xf32>
    %83 = arith.addf %79, %82 : vector<4x128xf32>
    %c0_46 = arith.constant 0 : index
    %c0_47 = arith.constant 0 : index
    %84 = vector.load %arg14[%c0_46, %c0_47] : memref<1x128xf32, #tpu.memory_space<vmem>>, vector<1x128xf32>
    %85 = vector.broadcast %84 : vector<1x128xf32> to vector<4x128xf32>
    %86 = arith.addf %83, %85 : vector<4x128xf32>
    %c0_48 = arith.constant 0 : index
    %c0_49 = arith.constant 0 : index
    %87 = vector.load %arg15[%c0_48, %c0_49] : memref<4x128xf32, #tpu.memory_space<vmem>>, vector<4x128xf32>
    tpu.vector_store %arg15[%c0_48, %c0_49], %86 {strides = array<i32>} : memref<4x128xf32, #tpu.memory_space<vmem>>, vector<4x128xf32>,
    %88 = tpu.concatenate %48, %46 in 1 : vector<4x64xf32>, vector<4x64xf32> -> vector<4x128xf32>
    %c0_50 = arith.constant 0 : index
    %c0_51 = arith.constant 0 : index
    %89 = vector.load %arg16[%c0_50, %c0_51] : memref<4x128xf32, #tpu.memory_space<vmem>>, vector<4x128xf32>
    tpu.vector_store %arg16[%c0_50, %c0_51], %88 {strides = array<i32>} : memref<4x128xf32, #tpu.memory_space<vmem>>, vector<4x128xf32>,
    %90 = tpu.concatenate %76, %72 in 1 : vector<4x64xf32>, vector<4x8xf32> -> vector<4x72xf32>
    %cst_52 = arith.constant 0.000000e+00 : f32
    %91 = vector.broadcast %cst_52 : f32 to vector<4x56xf32>
    %92 = tpu.concatenate %90, %91 in 1 : vector<4x72xf32>, vector<4x56xf32> -> vector<4x128xf32>
    %c0_53 = arith.constant 0 : index
    %c0_54 = arith.constant 0 : index
    %93 = vector.load %arg17[%c0_53, %c0_54] : memref<4x128xf32, #tpu.memory_space<vmem>>, vector<4x128xf32>
    tpu.vector_store %arg17[%c0_53, %c0_54], %92 {strides = array<i32>} : memref<4x128xf32, #tpu.memory_space<vmem>>, vector<4x128xf32>,
    return
  }
  func.func @transform_0(%arg0: i32) -> (i32, i32) {
    %c0_i32 = arith.constant 0 : i32
    %c0_i32_0 = arith.constant 0 : i32
    return %arg0, %c0_i32 : i32, i32
  }
  func.func @transform_1(%arg0: i32) -> (i32, i32) {
    %c0_i32 = arith.constant 0 : i32
    %c0_i32_0 = arith.constant 0 : i32
    return %arg0, %c0_i32 : i32, i32
  }
  func.func @transform_2(%arg0: i32) -> (i32, i32) {
    %c0_i32 = arith.constant 0 : i32
    %c0_i32_0 = arith.constant 0 : i32
    return %arg0, %c0_i32 : i32, i32
  }
  func.func @transform_3(%arg0: i32) -> (i32, i32) {
    %c0_i32 = arith.constant 0 : i32
    %c0_i32_0 = arith.constant 0 : i32
    return %arg0, %c0_i32 : i32, i32
  }
  func.func @transform_4(%arg0: i32) -> (i32, i32, i32) {
    %c0_i32 = arith.constant 0 : i32
    %c0_i32_0 = arith.constant 0 : i32
    %c0_i32_1 = arith.constant 0 : i32
    return %arg0, %c0_i32, %c0_i32_0 : i32, i32, i32
  }
  func.func @transform_5(%arg0: i32) -> (i32, i32) {
    %c0_i32 = arith.constant 0 : i32
    %c0_i32_0 = arith.constant 0 : i32
    return %arg0, %c0_i32 : i32, i32
  }
  func.func @transform_6(%arg0: i32) -> (i32, i32) {
    %c0_i32 = arith.constant 0 : i32
    %c0_i32_0 = arith.constant 0 : i32
    %c0_i32_1 = arith.constant 0 : i32
    return %c0_i32, %c0_i32_0 : i32, i32
  }
  func.func @transform_7(%arg0: i32) -> (i32, i32) {
    %c0_i32 = arith.constant 0 : i32
    %c0_i32_0 = arith.constant 0 : i32
    %c0_i32_1 = arith.constant 0 : i32
    return %c0_i32, %c0_i32_0 : i32, i32
  }
  func.func @transform_8(%arg0: i32) -> (i32, i32) {
    %c0_i32 = arith.constant 0 : i32
    %c0_i32_0 = arith.constant 0 : i32
    %c0_i32_1 = arith.constant 0 : i32
    return %c0_i32, %c0_i32_0 : i32, i32
  }
  func.func @transform_9(%arg0: i32) -> (i32, i32) {
    %c0_i32 = arith.constant 0 : i32
    %c0_i32_0 = arith.constant 0 : i32
    %c0_i32_1 = arith.constant 0 : i32
    return %c0_i32, %c0_i32_0 : i32, i32
  }
  func.func @transform_10(%arg0: i32) -> (i32, i32) {
    %c0_i32 = arith.constant 0 : i32
    %c0_i32_0 = arith.constant 0 : i32
    %c0_i32_1 = arith.constant 0 : i32
    return %c0_i32, %c0_i32_0 : i32, i32
  }
  func.func @transform_11(%arg0: i32) -> (i32, i32) {
    %c0_i32 = arith.constant 0 : i32
    %c0_i32_0 = arith.constant 0 : i32
    %c0_i32_1 = arith.constant 0 : i32
    return %c0_i32, %c0_i32_0 : i32, i32
  }
  func.func @transform_12(%arg0: i32) -> (i32, i32) {
    %c0_i32 = arith.constant 0 : i32
    %c0_i32_0 = arith.constant 0 : i32
    %c0_i32_1 = arith.constant 0 : i32
    return %c0_i32, %c0_i32_0 : i32, i32
  }
  func.func @transform_13(%arg0: i32) -> (i32, i32) {
    %c0_i32 = arith.constant 0 : i32
    %c0_i32_0 = arith.constant 0 : i32
    %c0_i32_1 = arith.constant 0 : i32
    return %c0_i32, %c0_i32_0 : i32, i32
  }
  func.func @transform_14(%arg0: i32) -> (i32, i32) {
    %c0_i32 = arith.constant 0 : i32
    %c0_i32_0 = arith.constant 0 : i32
    return %arg0, %c0_i32 : i32, i32
  }
  func.func @transform_15(%arg0: i32) -> (i32, i32) {
    %c0_i32 = arith.constant 0 : i32
    %c0_i32_0 = arith.constant 0 : i32
    return %arg0, %c0_i32 : i32, i32
  }
  func.func @transform_16(%arg0: i32) -> (i32, i32) {
    %c0_i32 = arith.constant 0 : i32
    %c0_i32_0 = arith.constant 0 : i32
    return %arg0, %c0_i32 : i32, i32
  }
}

</mosaic_0001>

<bundles_post_ra>
// kernel: tpu_custom_call.1
= control target key start
LH: loop header
LB: loop body
LE: loop exit
PB: predicated region body
PF: predicated region fallthrough
CT: control target
= control target key end

     0   :  { %s1906_s0 = inlined_call_operand.hbm [shape: f32[4,32], index: 0, kind: input, shape index: {}]   ;;  %s1907_s1 = inlined_call_operand.hbm [shape: f32[4,64], index: 1, kind: input, shape index: {}]   ;;  %s1908_s2 = inlined_call_operand.vmem [shape: f32[4,64], index: 2, kind: input, shape index: {}]   ;;  %s1909_s3 = inlined_call_operand.hbm [shape: f32[4,64], index: 3, kind: input, shape index: {}]   ;;  %s1910_s4 = inlined_call_operand.hbm [shape: bf16[4,8,64], index: 4, kind: input, shape index: {}]   ;;  %s1911_s5 = inlined_call_operand.hbm [shape: f32[4,8], index: 5, kind: input, shape index: {}]   ;;  %s1912_s6 = inlined_call_operand.hbm [shape: bf16[32,256], index: 6, kind: input, shape index: {}]   ;;  %s1913_s7 = inlined_call_operand.hbm [shape: bf16[64,256], index: 7, kind: input, shape index: {}]   ;;  %s1914_s8 = inlined_call_operand.hbm [shape: bf16[64,256], index: 8, kind: input, shape index: {}]   ;;  %s1915_s9 = inlined_call_operand.hbm [shape: f32[1,256], index: 9, kind: input, shape index: {}]   ;;  %s1916_s10 = inlined_call_operand.vmem [shape: bf16[64,64], index: 10, kind: input, shape index: {}]   ;;  %s1917_s11 = inlined_call_operand.hbm [shape: bf16[64,128], index: 11, kind: input, shape index: {}]   ;;  %s1918_s12 = inlined_call_operand.hbm [shape: bf16[64,128], index: 12, kind: input, shape index: {}]   ;;  %s1919_s13 = inlined_call_operand.vmem [shape: f32[1,128], index: 13, kind: input, shape index: {}]   ;;  %s1920_s14 = inlined_call_operand.hbm [shape: f32[4,128], index: 14, kind: output, shape index: {0}]   ;;  %s1921_s15 = inlined_call_operand.hbm [shape: f32[4,128], index: 15, kind: output, shape index: {1}]   ;;  %s1922_s16 = inlined_call_operand.hbm [shape: f32[4,128], index: 16, kind: output, shape index: {2}]  }
   0x1   :  { %1926 = sst [smem:[#allocation32_spill]] %s1906_s0 }
   0x2   :  { %22 = vsyncpa [#allocation3], 0 }
   0x3   :  { %23 = vsyncpa [#allocation6], 0 }
   0x4   :  { %24 = vsyncpa [#allocation9], 0 }
   0x5   :  { %25 = vsyncpa [#allocation12], 0 }
   0x6   :  { %26 = vsyncpa [#allocation15], 0 }
   0x7   :  { %27 = vsyncpa [#allocation18], 0 }
   0x8   :  { %28 = vsyncpa [#allocation4], 0 }
   0x9   :  { %29 = vsyncpa [#allocation22], 0  ;;  %s1483_s21 = smov [#allocation5]   ;;  %s1484_s23 = smov [#allocation8]  }
   0xa   :  { %s46_s22 = sshll.u32 %s1483_s21, 4  ;;  %s67_s24 = sshll.u32 %s1484_s23, 4  ;;  %s47_s22 = int_to_ptr.vmem [resolvable:$true] %s46_s22  ;;  %s1590_s24 = int_to_ptr.vmem [resolvable:$true] %s67_s24 }
   0xb   :  { %s1159_s27 = scalar_lea.hbm %s1907_s1, 64 }
   0xc   :  { %p1160_p0 = scmp.ne.s32.totalorder %s1907_s1, %s1159_s27  ;;  %p1163_p1 = scmp.lt.u32.totalorder %s1159_s27, %s1907_s1 }
   0xe   :  { %p1165_p2 = pnand %p1163_p1, %p1160_p0 }
  0x10   :  { %1168 = shalt.err (!%p1165_p2)
}
  0x11   :  { %s1169_s17 = scalar_lea.vmem %s47_s22, 64  ;;  %p1174_p4 = scmp.lt.s32.totalorder %s47_s22, %s47_s22 }
  0x12   :  { %p1170_p3 = scmp.ne.s32.totalorder %s47_s22, %s1169_s17  ;;  %p1175_p5 = scmp.lt.s32.totalorder %s1169_s17, %s1169_s17 }
  0x14   :  { %p1176_p6 = por %p1175_p5, %p1174_p4 }
  0x16   :  { %p1177_p7 = pnand %p1176_p6, %p1170_p3 }
  0x18   :  { %1180 = shalt.err (!%p1177_p7)
}
  0x19   :  { %49 = dma.hbm_to_vmem [thread:$0]  %s1907_s1, 64, %s47_s22, [#allocation6]  }
  0x1a   :  { %s1181_s23 = scalar_lea.hbm %s1910_s4, 256 }
  0x1b   :  { %p1182_p8 = scmp.ne.s32.totalorder %s1910_s4, %s1181_s23  ;;  %p1185_p9 = scmp.lt.u32.totalorder %s1181_s23, %s1910_s4 }
  0x1d   :  { %p1187_p10 = pnand %p1185_p9, %p1182_p8 }
  0x1f   :  { %1190 = shalt.err (!%p1187_p10)
}
  0x20   :  { %s1191_s29 = scalar_lea.vmem %s1590_s24, 256  ;;  %p1196_p12 = scmp.lt.s32.totalorder %s1590_s24, %s1590_s24 }
  0x21   :  { %p1192_p11 = scmp.ne.s32.totalorder %s1590_s24, %s1191_s29  ;;  %p1197_p13 = scmp.lt.s32.totalorder %s1191_s29, %s1191_s29 }
  0x23   :  { %p1198_p0 = por %p1197_p13, %p1196_p12 }
  0x25   :  { %p1199_p1 = pnand %p1198_p0, %p1192_p11 }
  0x27   :  { %1202 = shalt.err (!%p1199_p1)
}
  0x28   :  { %s1924_s1 = smov 64   ;;  %s1486_s22 = smov 4  }
  0x29   :  { %73 = dma.hbm_to_vmem [thread:$0]  %s1910_s4, 256, %s1590_s24, [#allocation9], %s1924_s1, %s1924_s1, %s1486_s22  }
  0x2a   :  { %s1487_s17 = smov [#allocation11]   ;;  %s1203_s21 = scalar_lea.hbm %s1912_s6, 512 }
  0x2b   :  { %s89_s18 = sshll.u32 %s1487_s17, 4  ;;  %p1204_p2 = scmp.ne.s32.totalorder %s1912_s6, %s1203_s21  ;;  %s90_s18 = int_to_ptr.vmem [resolvable:$true] %s89_s18 }
  0x2c   :  { %p1207_p3 = scmp.lt.u32.totalorder %s1203_s21, %s1912_s6 }
  0x2e   :  { %p1209_p4 = pnand %p1207_p3, %p1204_p2 }
  0x30   :  { %1212 = shalt.err (!%p1209_p4)
}
  0x31   :  { %s1213_s28 = scalar_lea.vmem %s90_s18, 512  ;;  %p1218_p6 = scmp.lt.s32.totalorder %s90_s18, %s90_s18 }
  0x32   :  { %p1214_p5 = scmp.ne.s32.totalorder %s90_s18, %s1213_s28  ;;  %p1219_p7 = scmp.lt.s32.totalorder %s1213_s28, %s1213_s28 }
  0x34   :  { %p1220_p8 = por %p1219_p7, %p1218_p6 }
  0x36   :  { %p1221_p9 = pnand %p1220_p8, %p1214_p5 }
  0x38   :  { %1224 = shalt.err (!%p1221_p9)
}
  0x39   :  { %s1488_s4 = smov 128   ;;  %s1489_s24 = smov 8  }
  0x3a   :  { %95 = dma.hbm_to_vmem [thread:$0]  %s1912_s6, 512, %s90_s18, [#allocation12], %s1488_s4, %s1488_s4, %s1489_s24  }
  0x3b   :  { %s1490_s0 = smov [#allocation14]   ;;  %s1491_s19 = smov [#allocation17]  }
  0x3c   :  { %s113_s17 = sshll.u32 %s1490_s0, 4  ;;  %s137_s20 = sshll.u32 %s1491_s19, 4  ;;  %s114_s17 = int_to_ptr.vmem [resolvable:$true] %s113_s17  ;;  %s138_s20 = int_to_ptr.vmem [resolvable:$true] %s137_s20 }
  0x3d   :  { %s1225_s25 = scalar_lea.hbm %s1914_s8, 1024 }
  0x3e   :  { %p1226_p10 = scmp.ne.s32.totalorder %s1914_s8, %s1225_s25  ;;  %p1229_p11 = scmp.lt.u32.totalorder %s1225_s25, %s1914_s8 }
  0x40   :  { %p1231_p12 = pnand %p1229_p11, %p1226_p10 }
  0x42   :  { %1234 = shalt.err (!%p1231_p12)
}
  0x43   :  { %s1235_s6 = scalar_lea.vmem %s114_s17, 1024  ;;  %p1240_p0 = scmp.lt.s32.totalorder %s114_s17, %s114_s17 }
  0x44   :  { %p1236_p13 = scmp.ne.s32.totalorder %s114_s17, %s1235_s6  ;;  %p1241_p1 = scmp.lt.s32.totalorder %s1235_s6, %s1235_s6 }
  0x46   :  { %p1242_p2 = por %p1241_p1, %p1240_p0 }
  0x48   :  { %p1243_p3 = pnand %p1242_p2, %p1236_p13 }
  0x4a   :  { %1246 = shalt.err (!%p1243_p3)
}
  0x4b   :  { %119 = dma.hbm_to_vmem [thread:$0]  %s1914_s8, 1024, %s114_s17, [#allocation15], %s1488_s4, %s1488_s4, %s1489_s24  }
  0x4c   :  { %s1247_s0 = scalar_lea.hbm %s1917_s11, 512 }
  0x4d   :  { %p1248_p4 = scmp.ne.s32.totalorder %s1917_s11, %s1247_s0  ;;  %p1251_p5 = scmp.lt.u32.totalorder %s1247_s0, %s1917_s11 }
  0x4f   :  { %p1253_p6 = pnand %p1251_p5, %p1248_p4 }
  0x51   :  { %1256 = shalt.err (!%p1253_p6)
}
  0x52   :  { %s1257_s26 = scalar_lea.vmem %s138_s20, 512  ;;  %p1262_p8 = scmp.lt.s32.totalorder %s138_s20, %s138_s20 }
  0x53   :  { %p1258_p7 = scmp.ne.s32.totalorder %s138_s20, %s1257_s26  ;;  %p1263_p9 = scmp.lt.s32.totalorder %s1257_s26, %s1257_s26 }
  0x55   :  { %p1264_p10 = por %p1263_p9, %p1262_p8 }
  0x57   :  { %p1265_p11 = pnand %p1264_p10, %p1258_p7 }
  0x59   :  { %1268 = shalt.err (!%p1265_p11)
}
  0x5a   :  { %s1927_s8 = smov 64   ;;  %s1492_s28 = smov [#allocation2]  }
  0x5b   :  { %143 = dma.hbm_to_vmem [thread:$0]  %s1917_s11, 512, %s138_s20, [#allocation18], %s1927_s8, %s1927_s8, %s1486_s22  }
  0x5c   :  { %s36_s6 = sshll.u32 %s1492_s28, 4  ;;  %s1493_s18 = smov [#allocation7]   ;;  %s37_s6 = int_to_ptr.vmem [resolvable:$true] %s36_s6 }
  0x5d   :  { %s58_s29 = sshll.u32 %s1493_s18, 4  ;;  %s1928_s0 = sld [smem:[#allocation32_spill]]  ;;  %s59_s29 = int_to_ptr.vmem [resolvable:$true] %s58_s29 }
  0x63   :  { %s1269_s19 = scalar_lea.hbm %s1928_s0, 64 }
  0x64   :  { %p1270_p12 = scmp.ne.s32.totalorder %s1928_s0, %s1269_s19  ;;  %p1273_p13 = scmp.lt.u32.totalorder %s1269_s19, %s1928_s0 }
  0x66   :  { %p1275_p0 = pnand %p1273_p13, %p1270_p12 }
  0x68   :  { %1278 = shalt.err (!%p1275_p0)
}
  0x69   :  { %s1279_s11 = scalar_lea.vmem %s37_s6, 64  ;;  %p1284_p2 = scmp.lt.s32.totalorder %s37_s6, %s37_s6 }
  0x6a   :  { %p1280_p1 = scmp.ne.s32.totalorder %s37_s6, %s1279_s11  ;;  %p1285_p3 = scmp.lt.s32.totalorder %s1279_s11, %s1279_s11 }
  0x6c   :  { %p1286_p4 = por %p1285_p3, %p1284_p2 }
  0x6e   :  { %p1287_p5 = pnand %p1286_p4, %p1280_p1 }
  0x70   :  { %1290 = shalt.err (!%p1287_p5)
}
  0x71   :  { %39 = dma.hbm_to_vmem [thread:$0]  %s1928_s0, 64, %s37_s6, [#allocation3]  }
  0x72   :  { %s1291_s18 = scalar_lea.hbm %s1909_s3, 64 }
  0x73   :  { %p1292_p6 = scmp.ne.s32.totalorder %s1909_s3, %s1291_s18  ;;  %p1295_p7 = scmp.lt.u32.totalorder %s1291_s18, %s1909_s3 }
  0x75   :  { %p1297_p8 = pnand %p1295_p7, %p1292_p6 }
  0x77   :  { %1300 = shalt.err (!%p1297_p8)
}
  0x78   :  { %s1301_s23 = scalar_lea.vmem %s59_s29, 64  ;;  %p1306_p10 = scmp.lt.s32.totalorder %s59_s29, %s59_s29 }
  0x79   :  { %p1302_p9 = scmp.ne.s32.totalorder %s59_s29, %s1301_s23  ;;  %p1307_p11 = scmp.lt.s32.totalorder %s1301_s23, %s1301_s23 }
  0x7b   :  { %p1308_p12 = por %p1307_p11, %p1306_p10 }
  0x7d   :  { %p1309_p13 = pnand %p1308_p12, %p1302_p9 }
  0x7f   :  { %1312 = shalt.err (!%p1309_p13)
}
  0x80   :  { %61 = dma.hbm_to_vmem [thread:$0]  %s1909_s3, 64, %s59_s29, [#allocation6]  }
  0x81   :  { %s1494_s25 = smov [#allocation10]   ;;  %s1495_s11 = smov [#allocation13]  }
  0x82   :  { %s80_s26 = sshll.u32 %s1494_s25, 4  ;;  %s101_s20 = sshll.u32 %s1495_s11, 4  ;;  %s81_s26 = int_to_ptr.vmem [resolvable:$true] %s80_s26  ;;  %s102_s20 = int_to_ptr.vmem [resolvable:$true] %s101_s20 }
  0x83   :  { %s1313_s28 = scalar_lea.hbm %s1911_s5, 64 }
  0x84   :  { %p1314_p0 = scmp.ne.s32.totalorder %s1911_s5, %s1313_s28  ;;  %p1317_p1 = scmp.lt.u32.totalorder %s1313_s28, %s1911_s5 }
  0x86   :  { %p1319_p2 = pnand %p1317_p1, %p1314_p0 }
  0x88   :  { %1322 = shalt.err (!%p1319_p2)
}
  0x89   :  { %s1323_s3 = scalar_lea.vmem %s81_s26, 64  ;;  %p1328_p4 = scmp.lt.s32.totalorder %s81_s26, %s81_s26 }
  0x8a   :  { %p1324_p3 = scmp.ne.s32.totalorder %s81_s26, %s1323_s3  ;;  %p1329_p5 = scmp.lt.s32.totalorder %s1323_s3, %s1323_s3 }
  0x8c   :  { %p1330_p6 = por %p1329_p5, %p1328_p4 }
  0x8e   :  { %p1331_p7 = pnand %p1330_p6, %p1324_p3 }
  0x90   :  { %1334 = shalt.err (!%p1331_p7)
}
  0x91   :  { %83 = dma.hbm_to_vmem [thread:$0]  %s1911_s5, 64, %s81_s26, [#allocation9]  }
  0x92   :  { %s1335_s0 = scalar_lea.hbm %s1913_s7, 1024 }
  0x93   :  { %p1336_p8 = scmp.ne.s32.totalorder %s1913_s7, %s1335_s0  ;;  %p1339_p9 = scmp.lt.u32.totalorder %s1335_s0, %s1913_s7 }
  0x95   :  { %p1341_p10 = pnand %p1339_p9, %p1336_p8 }
  0x97   :  { %1344 = shalt.err (!%p1341_p10)
}
  0x98   :  { %s1345_s28 = scalar_lea.vmem %s102_s20, 1024  ;;  %p1350_p12 = scmp.lt.s32.totalorder %s102_s20, %s102_s20 }
  0x99   :  { %p1346_p11 = scmp.ne.s32.totalorder %s102_s20, %s1345_s28  ;;  %p1351_p13 = scmp.lt.s32.totalorder %s1345_s28, %s1345_s28 }
  0x9b   :  { %p1352_p0 = por %p1351_p13, %p1350_p12 }
  0x9d   :  { %p1353_p1 = pnand %p1352_p0, %p1346_p11 }
  0x9f   :  { %1356 = shalt.err (!%p1353_p1)
}
  0xa0   :  { %107 = dma.hbm_to_vmem [thread:$0]  %s1913_s7, 1024, %s102_s20, [#allocation12], %s1488_s4, %s1488_s4, %s1489_s24  }
  0xa1   :  { %s1496_s18 = smov [#allocation16]   ;;  %s1497_s1 = smov [#allocation19]  }
  0xa2   :  { %s126_s30 = sshll.u32 %s1496_s18, 4  ;;  %s149_s19 = sshll.u32 %s1497_s1, 4  ;;  %s127_s30 = int_to_ptr.vmem [resolvable:$true] %s126_s30  ;;  %s150_s19 = int_to_ptr.vmem [resolvable:$true] %s149_s19 }
  0xa3   :  { %s1357_s21 = scalar_lea.hbm %s1915_s9, 32 }
  0xa4   :  { %p1358_p2 = scmp.ne.s32.totalorder %s1915_s9, %s1357_s21  ;;  %p1361_p3 = scmp.lt.u32.totalorder %s1357_s21, %s1915_s9 }
  0xa6   :  { %p1363_p4 = pnand %p1361_p3, %p1358_p2 }
  0xa8   :  { %1366 = shalt.err (!%p1363_p4)
}
  0xa9   :  { %s1367_s7 = scalar_lea.vmem %s127_s30, 32  ;;  %p1372_p6 = scmp.lt.s32.totalorder %s127_s30, %s127_s30 }
  0xaa   :  { %p1368_p5 = scmp.ne.s32.totalorder %s127_s30, %s1367_s7  ;;  %p1373_p7 = scmp.lt.s32.totalorder %s1367_s7, %s1367_s7 }
  0xac   :  { %p1374_p8 = por %p1373_p7, %p1372_p6 }
  0xae   :  { %p1375_p9 = pnand %p1374_p8, %p1368_p5 }
  0xb0   :  { %1378 = shalt.err (!%p1375_p9)
}
  0xb1   :  { %129 = dma.hbm_to_vmem [thread:$0]  %s1915_s9, 32, %s127_s30, [#allocation15]  }
  0xb2   :  { %s1379_s17 = scalar_lea.hbm %s1918_s12, 512 }
  0xb3   :  { %p1380_p10 = scmp.ne.s32.totalorder %s1918_s12, %s1379_s17  ;;  %p1383_p11 = scmp.lt.u32.totalorder %s1379_s17, %s1918_s12 }
  0xb5   :  { %p1385_p12 = pnand %p1383_p11, %p1380_p10 }
  0xb7   :  { %1388 = shalt.err (!%p1385_p12)
}
  0xb8   :  { %s1389_s18 = scalar_lea.vmem %s150_s19, 512  ;;  %p1394_p0 = scmp.lt.s32.totalorder %s150_s19, %s150_s19 }
  0xb9   :  { %p1390_p13 = scmp.ne.s32.totalorder %s150_s19, %s1389_s18  ;;  %p1395_p1 = scmp.lt.s32.totalorder %s1389_s18, %s1389_s18 }
  0xbb   :  { %p1396_p2 = por %p1395_p1, %p1394_p0 }
  0xbd   :  { %p1397_p3 = pnand %p1396_p2, %p1390_p13 }
  0xbf   :  { %1400 = shalt.err (!%p1397_p3)
}
  0xc0   :  { %155 = dma.hbm_to_vmem [thread:$0]  %s1918_s12, 512, %s150_s19, [#allocation18], %s1927_s8, %s1927_s8, %s1486_s22  }
  0xc1   :  { %1467 = dma.done.wait [#allocation3], 64  }
  0xc2   :  { %1468 = vsyncadd [#allocation3], 4294967232 }
  0xc3   :  { %1469 = dma.done.wait [#allocation6], 128  }
  0xc4   :  { %1470 = vsyncadd [#allocation6], 4294967168 }
  0xc5   :  { %1471 = dma.done.wait [#allocation9], 320  }
  0xc6   :  { %1472 = vsyncadd [#allocation9], 4294966976 }
  0xc7   :  { %1473 = dma.done.wait [#allocation12], 1536  }
  0xc8   :  { %1474 = vsyncadd [#allocation12], 4294965760 }
  0xc9   :  { %1475 = dma.done.wait [#allocation15], 1056  }
  0xca   :  { %1476 = vsyncadd [#allocation15], 4294966240 }
  0xcb   :  { %1477 = dma.done.wait [#allocation18], 1024  }
  0xcc   :  { %1478 = vsyncadd [#allocation18], 4294966272  ;;  %v1498_v0 = vmov 0   ;;  %v1105_v1 = vld [vmem:[#allocation13 + $0x4] ss:$8 sps:$4 sm:$0xff]   ;;  %vm313_vm0 = vcmask 261120   ;;  %v456_v32 = vlaneseq }
  0xcd   :  { %349 = vmatprep.mubr.bf16.mxu1 %v1498_v0  ;;  %284 = vmatprep.mubr.bf16.mxu0 %v1498_v0  ;;  %v1107_v2 = vld [vmem:[#allocation11 + $0x4] ss:$8 sps:$4 sm:$0xff]   ;;  %v1109_v3 = vld [vmem:[#allocation13] ss:$8 sps:$4 sm:$0xff]   ;;  %v1111_v5 = vld [vmem:[#allocation13 + $0x14] ss:$8 sps:$4 sm:$0xff]  }
  0xce   :  { %252 = vmatprep.subr.bf16.mxu0 %v1105_v1  ;;  %v1110_v4 = vld [vmem:[#allocation11] ss:$8 sps:$4 sm:$0xff]   ;;  %317 = vmatprep.subr.bf16.mxu1 %v1107_v2  ;;  %v1113_v6 = vld [vmem:[#allocation11 + $0x14] ss:$8 sps:$4 sm:$0xff]   ;;  %v1115_v7 = vld [vmem:[#allocation13 + $0x10] ss:$8 sps:$4 sm:$0xff]  }
  0xcf   :  { %253 = vmatpush1.bf16.msra.mxu0 %v1109_v3  ;;  %318 = vmatpush1.bf16.msra.mxu1 %v1110_v4  ;;  %v1116_v8 = vld [vmem:[#allocation11 + $0x10] ss:$8 sps:$4 sm:$0xff]   ;;  %v1117_v9 = vld [vmem:[#allocation13 + $0x24] ss:$8 sps:$4 sm:$0xff]   ;;  %v192_v10 = vld [vmem:[#allocation2] sm:$0xf] }
  0xd0   :  { %254 = vmatprep.subr.bf16.mxu0 %v1111_v5  ;;  %319 = vmatprep.subr.bf16.mxu1 %v1113_v6  ;;  %v193_v11 = vpack.c.bf16 %v192_v10, %v192_v10  ;;  %v1119_v12 = vld [vmem:[#allocation14] ss:$8 sps:$4 sm:$0xff]   ;;  %v1121_v13 = vld [vmem:[#allocation14 + $0x4] ss:$8 sps:$4 sm:$0xff]   ;;  %v1123_v15 = vld [vmem:[#allocation13 + $0x34] ss:$8 sps:$4 sm:$0xff]  }
  0xd1   :  { %v1122_v14 = vld [vmem:[#allocation13 + $0x20] ss:$8 sps:$4 sm:$0xff]   ;;  %v1127_v16 = vld [vmem:[#allocation14 + $0x14] ss:$8 sps:$4 sm:$0xff]   ;;  %v1125_v17 = vld [vmem:[#allocation14 + $0x10] ss:$8 sps:$4 sm:$0xff]  }
  0xd2   :  { %v1128_v18 = vld [vmem:[#allocation13 + $0x30] ss:$8 sps:$4 sm:$0xff]   ;;  %v198_v19 = vld [vmem:[#allocation5] sm:$0xf]  ;;  %vm248_vm1 = vcmask 523264   ;;  %v1754_v33 = vshrl.u32 %v456_v32, 7 }
  0xd3   :  { %255 = vmatpush1.bf16.msra.mxu0 %v1115_v7  ;;  %320 = vmatpush1.bf16.msra.mxu1 %v1116_v8  ;;  %v1131_v20 = vld [vmem:[#allocation14 + $0x24] ss:$8 sps:$4 sm:$0xff]   ;;  %v1129_v21 = vld [vmem:[#allocation14 + $0x20] ss:$8 sps:$4 sm:$0xff]   ;;  %v199_v23 = vpack.c.bf16 %v198_v19, %v198_v19  ;;  %v1134_v24 = vld [vmem:[#allocation14 + $0x34] ss:$8 sps:$4 sm:$0xff]  }
  0xd4   :  { %256 = vmatprep.subr.bf16.mxu0 %v1117_v9  ;;  %411 = vmatprep.subr.bf16.mxu1 %v1121_v13  ;;  %v477_v22 = vld [vmem:[#allocation7] sm:$0xf]  ;;  %v1132_v25 = vld [vmem:[#allocation14 + $0x30] ss:$8 sps:$4 sm:$0xff]   ;;  %v358_v26 = vld [vmem:[%s1908_s2] sm:$0xf] }
  0xd5   :  { %479 = vrot.lane.b32.xlu0 %v477_v22, %s1927_s8  ;;  %v359_v27 = vpack.c.bf16 %v358_v26, %v358_v26  ;;  %v1757_v40 = vsub.s32 0, %v1754_v33  ;;  %v454_v41 = vld [vmem:[#allocation16] sm:$0x3]  ;;  %v462_v43 = vsub.s32 1, %v1754_v33  ;;  %v1136_v60 = vld [vmem:[#allocation19] sm:$0xff]   ;;  %v1499_v61 = vmov 0.0  }
  0xd6   :  { %997 = vmatmul.mubr.msk.bf16.vlgmr.msra.gmra.mrb[0].mxu1 %vm313_vm0, %v193_v11  ;;  %v1135_v59 = vld [vmem:[%s1916_s10] sm:$0xff]   ;;  %v1137_v62 = vld [vmem:[%s1916_s10 + $0x8] sm:$0xff]   ;;  %vm1500_vm2 = vmmov 0   ;;  %v1140_v1 = vld [vmem:[#allocation19 + $0x10] sm:$0xff]   ;;  %vm663_vm3 = vcmask 1041409   ;;  %vm665_vm4 = vcmask 1042434  }
  0xd7   :  { %257 = vmatpush1.bf16.msra.mxu0 %v1122_v14  ;;  %412 = vmatpush1.bf16.msra.mxu1 %v1119_v12  ;;  %v459_v42 = vrot.slane %v454_v41, %v1757_v40  ;;  %v463_v50 = vrot.slane %v454_v41, %v462_v43  ;;  %v1138_v63 = vld [vmem:[#allocation19 + $0x8] sm:$0xff]   ;;  %v1141_v2 = vld [vmem:[%s1916_s10 + $0x18] sm:$0xff]   ;;  %vm667_vm5 = vcmask 1043459   ;;  %vm671_vm7 = vcmask 60416  }
  0xd8   :  { %258 = vmatprep.subr.bf16.mxu0 %v1123_v15  ;;  %413 = vmatprep.subr.bf16.mxu1 %v1127_v16  ;;  %v1142_v3 = vld [vmem:[#allocation19 + $0x18] sm:$0xff]   ;;  %v1501_v16 = vmov 1966171168   ;;  %v1804_v22 = vld [vmem:[#allocation8] sm:$0xff]   ;;  %vm934_vm8 = vcmask 588800  }
  0xd9   :  { %443 = vmatprep.mubr.bf16.mxu1 %v1498_v0  ;;  %v1139_v0 = vld [vmem:[%s1916_s10 + $0x10] sm:$0xff]   ;;  %s1502_s10 = smov [#allocation21]  }
  0xdb   :  { %259 = vmatpush1.bf16.msra.mxu0 %v1128_v18  ;;  %414 = vmatpush1.bf16.msra.mxu1 %v1125_v17  ;;  %v580_v17 = vunpack.c.l.s4 %v1501_v16 }
  0xdc   :  { %415 = vmatprep.subr.bf16.mxu1 %v1131_v20  ;;  %1047 = vmatprep.subr.bf16.mxu0 %v1499_v61 }
  0xdd   :  { %v581_v18 = vunpack.c.0.s8 %v580_v17 }
  0xde   :  { %992 = vmatmul.mubr.msk.bf16.vlgmr.msra.gmra.mrb[0].mxu0 %vm248_vm1, %v199_v23 }
  0xdf   :  { %416 = vmatpush1.bf16.msra.mxu1 %v1129_v21  ;;  %1048 = vmatpush3.bf16.msra.mxu0 %v1135_v59  ;;  %v584_v19 = vsub.s32 %v581_v18, %v1754_v33 }
  0xe0   :  { %417 = vmatprep.subr.bf16.mxu1 %v1134_v24  ;;  %1049 = vmatprep.subr.bf16.mxu0 %v1499_v61 }
  0xe1   :  { %1055 = vmatprep.mubr.msk.bf16.mxu0 %vm1500_vm2, %v1499_v61 }
  0xe3   :  { %418 = vmatpush1.bf16.msra.mxu1 %v1132_v25  ;;  %1050 = vmatpush3.bf16.msra.mxu0 %v1137_v62 }
  0xe4   :  { %1059 = vmatprep.subr.bf16.mxu1 %v1499_v61  ;;  %1051 = vmatprep.subr.bf16.mxu0 %v1499_v61 }
  0xe6   :  { %1006 = vmatmul.mubr.msk.bf16.vlgmr.msra.gmra.mrb[4].mxu1 %vm248_vm1, %v359_v27 }
  0xe7   :  { %1060 = vmatpush3.bf16.msra.mxu1 %v1136_v60  ;;  %1067 = vmatprep.mubr.msk.bf16.mxu1 %vm1500_vm2, %v1499_v61 }
  0xe8   :  { %1061 = vmatprep.subr.bf16.mxu1 %v1499_v61  ;;  %1052 = vmatpush3.bf16.msra.mxu0 %v1139_v0 }
  0xe9   :  { %1053 = vmatprep.subr.bf16.mxu0 %v1499_v61 }
  0xeb   :  { %1062 = vmatpush3.bf16.msra.mxu1 %v1138_v63  ;;  %v639_v63 = vld [vmem:[#allocation10] sm:$0xf] }
  0xec   :  { %1063 = vmatprep.subr.bf16.mxu1 %v1499_v61  ;;  %1054 = vmatpush3.bf16.msra.mxu0 %v1141_v2  ;;  %vm640_vm6 = vcmp.gt.f32.partialorder %v639_v63, 0.0 }
  0xed   :  { %1071 = vmatprep.subr.bf16.mxu0 %v1499_v61 }
  0xef   :  { %1064 = vmatpush3.bf16.msra.mxu1 %v1140_v1 }
  0xf0   :  { %1065 = vmatprep.subr.bf16.mxu1 %v1499_v61 }
  0xf3   :  { %1066 = vmatpush3.bf16.msra.mxu1 %v1142_v3 }
 0x147   :  { %v480_v5 = vpop.permute.xlu0 %479 }
 0x1a9   :  { %v351_v28 = vpop.f32.mrb[0].mxu1 }
 0x1aa   :  { %v353_v29 = vpop.f32.mrb[1].mxu1 }
 0x1ab   :  { %v355_v30 = vpop.f32.mrb[2].mxu1 }
 0x1ac   :  { %v356_v31 = vpop.f32.mrb[3].mxu1 }
 0x1b1   :  { %v286_v34 = vpop.f32.mrb[0].mxu0 }
 0x1b2   :  { %v352_v35 = vadd.f32 %v351_v28, %v286_v34  ;;  %v288_v36 = vpop.f32.mrb[1].mxu0  ;;  %v1025_v34 = vunpack.c.l.bf16 %v1804_v22 }
 0x1b3   :  { %v354_v37 = vadd.f32 %v353_v29, %v288_v36  ;;  %v290_v38 = vpop.f32.mrb[2].mxu0 }
 0x1b4   :  { %v291_v39 = vpop.f32.mrb[3].mxu0 }
 0x1b5   :  { %v1026_v39 = vunpack.c.h.bf16 %v1804_v22 }
 0x1b9   :  { %v445_v44 = vpop.f32.mrb[4].mxu1 }
 0x1ba   :  { %v452_v45 = vadd.f32 %v445_v44, %v352_v35  ;;  %v447_v46 = vpop.f32.mrb[5].mxu1  ;;  %v1807_v35 = vld [vmem:[#allocation8 + $0x8] sm:$0xff]  }
 0x1bb   :  { %v453_v47 = vadd.f32 %v447_v46, %v354_v37  ;;  %v449_v48 = vpop.f32.mrb[6].mxu1  ;;  %v1030_v41 = vunpack.c.h.bf16 %v1807_v35 }
 0x1bc   :  { %v466_v49 = vadd.f32 %v459_v42, %v452_v45  ;;  %v450_v51 = vpop.f32.mrb[7].mxu1  ;;  %v1029_v42 = vunpack.c.l.bf16 %v1807_v35 }
 0x1bd   :  { %v467_v53 = vadd.f32 %v463_v50, %v453_v47 }
 0x1be   :  { %v468_v52 = vmul.f32 0.5, %v466_v49 }
 0x1bf   :  { %v473_v4 = vmul.f32 0.5, %v467_v53 }
 0x1c0   :  { %1147 = vtanh.f32 %v468_v52 }
 0x1c1   :  { %1149 = vtanh.f32 %v467_v53 }
 0x1c2   :  { %1151 = vtanh.f32 %v473_v4 }
 0x1ca   :  { %v1148_v54 = vpop.eup %1147 }
 0x1cb   :  { %v470_v55 = vadd.f32 1.0, %v1148_v54  ;;  %v1150_v57 = vpop.eup %1149 }
 0x1cc   :  { %v1152_v9 = vpop.eup %1151 }
 0x1cd   :  { %v471_v56 = vmul.f32 0.5, %v470_v55  ;;  %v475_v10 = vadd.f32 1.0, %v1152_v9 }
 0x1cf   :  { %v483_v58 = vmul.f32 %v1150_v57, %v471_v56  ;;  %v482_v6 = vmul.f32 %v480_v5, %v471_v56  ;;  %v476_v11 = vmul.f32 0.5, %v475_v10  ;;  %v646_v56 = vand.u32 127, %v456_v32 }
 0x1d1   :  { %485 = vrot.lane.b32.xlu0 %v483_v58, %s1927_s8  ;;  %v649_v58 = vsub.s32 %v646_v56, %v1754_v33 }
 0x243   :  { %v486_v7 = vpop.permute.xlu0 %485 }
 0x244   :  { %v1789_v8 = vadd.f32 %v486_v7, %v482_v6 }
 0x246   :  { %1153 = vtanh.f32 %v1789_v8 }
 0x250   :  { %v1154_v12 = vpop.eup %1153 }
 0x251   :  { %v1792_v13 = vmul.f32 %v1154_v12, %v476_v11 }
 0x253   :  { %v499_v14 = vpack.c.bf16 %v1792_v13, %v1792_v13 }
 0x255   :  { %509 = vrot.lane.b32.xlu1 %v499_v14, %s1927_s8 }
 0x2c7   :  { %v510_v15 = vpop.permute.xlu1 %509 }
 0x2c8   :  { %1056 = vmatmul.mubr.msk.bf16.vlgmr.msra.gmra.mrb[4].mxu0 %vm248_vm1, %v510_v15  ;;  %1068 = vmatmul.mubr.msk.bf16.vlgmr.msra.gmra.mrb[8].mxu1 %vm248_vm1, %v510_v15 }
 0x2c9   :  { %1079 = vmatprep.mubr.msk.bf16.mxu0 %vm1500_vm2, %v1499_v61 }
 0x39b   :  { %v572_v20 = vpop.f32.mrb[4].mxu0  ;;  %v1802_v21 = vpop.f32.mrb[8].mxu1 }
 0x39c   :  { %v585_v23 = vrot.slane %v572_v20, %v584_v19  ;;  %v1057_v24 = vpop.f32.mrb[5].mxu0  ;;  %v1069_v25 = vpop.f32.mrb[9].mxu1  ;;  %v699_v20 = vsub.s32 2, %v1754_v33 }
 0x39d   :  { %v575_v26 = vpop.f32.mrb[6].mxu0  ;;  %v824_v27 = vpop.f32.mrb[10].mxu1  ;;  %v1143_v24 = vld [vmem:[#allocation17] sm:$0xff]  }
 0x39e   :  { %v586_v28 = vcombine.high %v585_v23, %v585_v23  ;;  %v593_v29 = vrot.slane %v585_v23, %v584_v19  ;;  %v1058_v30 = vpop.f32.mrb[7].mxu0  ;;  %v1070_v31 = vpop.f32.mrb[11].mxu1  ;;  %v706_v23 = vsub.s32 3, %v1754_v33  ;;  %1072 = vmatpush3.bf16.msra.mxu0 %v1143_v24  ;;  %v1144_v27 = vld [vmem:[#allocation17 + $0x8] sm:$0xff]   ;;  %v1146_v33 = vld [vmem:[#allocation17 + $0x18] sm:$0xff]  }
 0x39f   :  { %1073 = vmatprep.subr.bf16.mxu0 %v1499_v61 }
 0x3a0   :  { %v600_v36 = vrot.slane %v586_v28, %v584_v19  ;;  %v601_v37 = vcombine.high %v593_v29, %v593_v29  ;;  %v606_v38 = vrot.slane %v593_v29, %v1757_v40 }
 0x3a2   :  { %v623_v44 = vmul.f32 %v1025_v34, %v606_v38  ;;  %v610_v45 = vrot.slane %v600_v36, %v1757_v40  ;;  %v602_v46 = vcombine.high %v600_v36, %v600_v36  ;;  %v614_v47 = vrot.slane %v601_v37, %v1757_v40  ;;  %1074 = vmatpush3.bf16.msra.mxu0 %v1144_v27 }
 0x3a3   :  { %1075 = vmatprep.subr.bf16.mxu0 %v1499_v61 }
 0x3a4   :  { %v627_v48 = vsel %vm248_vm1, %v623_v44, 0.0  ;;  %v624_v49 = vmul.f32 %v1026_v39, %v610_v45  ;;  %v618_v50 = vrot.slane %v602_v46, %v1757_v40  ;;  %v625_v53 = vmul.f32 %v1029_v42, %v614_v47 }
 0x3a5   :  { %628 = vadd.xlane.f32.xlu1 %v627_v48 }
 0x3a6   :  { %v630_v51 = vsel %vm248_vm1, %v624_v49, 0.0  ;;  %v626_v52 = vmul.f32 %v1030_v41, %v618_v50  ;;  %v633_v55 = vsel %vm248_vm1, %v625_v53, 0.0 }
 0x3a7   :  { %631 = vadd.xlane.f32.xlu0 %v630_v51 }
 0x3a8   :  { %v636_v54 = vsel %vm248_vm1, %v626_v52, 0.0 }
 0x3a9   :  { %637 = vadd.xlane.f32.xlu1 %v636_v54 }
 0x3ab   :  { %634 = vadd.xlane.f32.xlu0 %v633_v55 }
 0x432   :  { %v629_v57 = vpop.xlane.xlu1 %628 }
 0x433   :  { %v650_v0 = vrot.slane %v629_v57, %v649_v58 }
 0x434   :  { %v632_v59 = vpop.xlane.xlu0 %631 }
 0x435   :  { %v654_v60 = vrot.slane %v632_v59, %v649_v58 }
 0x436   :  { %v638_v62 = vpop.xlane.xlu1 %637 }
 0x437   :  { %v664_v3 = vsel %vm663_vm3, %v654_v60, %v650_v0  ;;  %v662_v4 = vrot.slane %v638_v62, %v649_v58 }
 0x438   :  { %v635_v1 = vpop.xlane.xlu0 %634 }
 0x439   :  { %v658_v2 = vrot.slane %v635_v1, %v649_v58 }
 0x43b   :  { %v666_v5 = vsel %vm665_vm4, %v658_v2, %v664_v3 }
 0x43c   :  { %v668_v32 = vsel %vm667_vm5, %v662_v4, %v666_v5 }
 0x43d   :  { %v670_v6 = vsel %vm640_vm6, %v668_v32, -1e+10 }
 0x43e   :  { %v672_v7 = vsel %vm671_vm7, %v670_v6, -inf }
 0x43f   :  { %673 = vmax.xlane.f32.xlu0 %v672_v7 }
 0x4cc   :  { %v674_v9 = vpop.xlane.xlu0 %673 }
 0x4cd   :  { %v675_v10 = vsub.f32 %v670_v6, %v674_v9 }
 0x4cf   :  { %v676_v11 = vmul.f32 1.442695, %v675_v10 }
 0x4d1   :  { %1155 = vpow2.f32 %v676_v11 }
 0x4db   :  { %v1156_v12 = vpop.eup %1155 }
 0x4dc   :  { %v678_v14 = vsel %vm671_vm7, %v1156_v12, 0.0 }
 0x4dd   :  { %679 = vadd.xlane.f32.xlu1 %v678_v14 }
 0x56a   :  { %v680_v15 = vpop.xlane.xlu1 %679 }
 0x56b   :  { %1157 = vrcp.f32 %v680_v15 }
 0x575   :  { %v1158_v16 = vpop.eup %1157 }
 0x576   :  { %v682_v17 = vmul.f32 %v1158_v16, %v1156_v12 }
 0x578   :  { %v693_v18 = vrot.slane %v682_v17, %v462_v43  ;;  %v686_v19 = vrot.slane %v682_v17, %v1757_v40  ;;  %v700_v25 = vrot.slane %v682_v17, %v699_v20  ;;  %v707_v26 = vrot.slane %v682_v17, %v706_v23  ;;  %v1145_v43 = vld [vmem:[#allocation17 + $0x10] sm:$0xff]  }
 0x579   :  { %1076 = vmatpush3.bf16.msra.mxu0 %v1145_v43 }
 0x57a   :  { %695 = vbcast.lane.b32.xlu1 %v693_v18, 256  ;;  %688 = vbcast.lane.b32.xlu0 %v686_v19, 256 }
 0x57b   :  { %1077 = vmatprep.subr.bf16.mxu0 %v1499_v61 }
 0x57d   :  { %1078 = vmatpush3.bf16.msra.mxu0 %v1146_v33 }
 0x57e   :  { %702 = vbcast.lane.b32.xlu1 %v700_v25, 256  ;;  %709 = vbcast.lane.b32.xlu0 %v707_v26, 256 }
 0x582   :  { %916 = vrot.lane.b32.xlu1 %v1792_v13, %s1927_s8  ;;  %930 = vrot.lane.b32.xlu0 %v682_v17, %s1927_s8  ;;  %s953_s8 = sshll.u32 %s1502_s10, 4  ;;  %s954_s8 = int_to_ptr.vmem [resolvable:$true] %s953_s8 }
 0x583   :  { %s1401_s0 = scalar_lea.vmem %s954_s8, 64  ;;  %p1406_p5 = scmp.lt.s32.totalorder %s954_s8, %s954_s8 }
 0x584   :  { %p1402_p4 = scmp.ne.s32.totalorder %s954_s8, %s1401_s0  ;;  %p1407_p6 = scmp.lt.s32.totalorder %s1401_s0, %s1401_s0 }
 0x586   :  { %p1408_p7 = por %p1407_p6, %p1406_p5 }
 0x588   :  { %p1409_p8 = pnand %p1408_p7, %p1402_p4 }
 0x5ec   :  { %v696_v40 = vpop.permute.xlu1 %695  ;;  %v689_v28 = vpop.permute.xlu0 %688 }
 0x5ed   :  { %v712_v29 = vmul.f32 %v1026_v39, %v696_v40  ;;  %v711_v30 = vmul.f32 %v1025_v34, %v689_v28 }
 0x5ef   :  { %v722_v31 = vsel %vm248_vm1, %v712_v29, 0.0  ;;  %v715_v36 = vsel %vm248_vm1, %v711_v30, 0.0 }
 0x5f0   :  { %v723_v13 = vrot.slane %v722_v31, 4  ;;  %v716_v37 = vrot.slane %v715_v36, 4  ;;  %v703_v38 = vpop.permute.xlu1 %702  ;;  %v710_v44 = vpop.permute.xlu0 %709 }
 0x5f1   :  { %v713_v61 = vmul.f32 %v1029_v42, %v703_v38  ;;  %v714_v45 = vmul.f32 %v1030_v41, %v710_v44 }
 0x5f2   :  { %v724_v46 = vadd.f32 %v723_v13, %v722_v31  ;;  %v717_v47 = vadd.f32 %v716_v37, %v715_v36 }
 0x5f3   :  { %v729_v39 = vsel %vm248_vm1, %v713_v61, 0.0  ;;  %v736_v22 = vsel %vm248_vm1, %v714_v45, 0.0 }
 0x5f4   :  { %v725_v34 = vrot.slane %v724_v46, 2  ;;  %v718_v48 = vrot.slane %v717_v47, 2  ;;  %v730_v49 = vrot.slane %v729_v39, 4  ;;  %v737_v50 = vrot.slane %v736_v22, 4  ;;  %v917_v51 = vpop.permute.xlu1 %916  ;;  %v931_v11 = vpop.permute.xlu0 %930 }
 0x5f5   :  { %v919_v52 = vsel %vm248_vm1, %v917_v51, %v1789_v8 }
 0x5f6   :  { %v726_v53 = vadd.f32 %v725_v34, %v724_v46  ;;  %v719_v54 = vadd.f32 %v718_v48, %v717_v47  ;;  %v731_v42 = vadd.f32 %v730_v49, %v729_v39  ;;  %v738_v55 = vadd.f32 %v737_v50, %v736_v22  ;;  %920 = vst [vmem:[#allocation21] sm:$0xf] %v919_v52 }
 0x5f8   :  { %v727_v35 = vrot.slane %v726_v53, 1  ;;  %v720_v41 = vrot.slane %v719_v54, 1  ;;  %v732_v56 = vrot.slane %v731_v42, 2  ;;  %v739_v57 = vrot.slane %v738_v55, 2 }
 0x5fa   :  { %v728_v58 = vadd.f32 %v727_v35, %v726_v53  ;;  %v721_v59 = vadd.f32 %v720_v41, %v719_v54  ;;  %v733_v60 = vadd.f32 %v732_v56, %v731_v42  ;;  %v740_v62 = vadd.f32 %v739_v57, %v738_v55 }
 0x5fc   :  { %v744_v63 = vpack.c.bf16 %v728_v58, %v728_v58  ;;  %v743_v0 = vpack.c.bf16 %v721_v59, %v721_v59  ;;  %v734_v1 = vrot.slane %v733_v60, 1  ;;  %v741_v2 = vrot.slane %v740_v62, 1 }
 0x5fd   :  { %v925_v32 = vsel %vm663_vm3, %v728_v58, %v721_v59 }
 0x5fe   :  { %v735_v3 = vadd.f32 %v734_v1, %v733_v60  ;;  %v742_v4 = vadd.f32 %v741_v2, %v740_v62  ;;  %v832_v8 = vunpack.c.l.b16 %v744_v63  ;;  %v831_v5 = vunpack.c.l.b16 %v743_v0 }
 0x600   :  { %v745_v6 = vpack.c.bf16 %v735_v3, %v735_v3  ;;  %v746_v7 = vpack.c.bf16 %v742_v4, %v742_v4  ;;  %v926_v9 = vsel %vm665_vm4, %v735_v3, %v925_v32  ;;  %v835_v16 = vsel %vm663_vm3, %v832_v8, %v831_v5 }
 0x601   :  { %v927_v10 = vsel %vm667_vm5, %v742_v4, %v926_v9 }
 0x602   :  { %v833_v12 = vunpack.c.l.b16 %v745_v6  ;;  %v834_v14 = vunpack.c.l.b16 %v746_v7  ;;  %v933_v15 = vsel %vm248_vm1, %v927_v10, %v931_v11 }
 0x603   :  { %v935_v17 = vsel %vm934_vm8, %v933_v15, 0.0 }
 0x604   :  { %936 = vst [vmem:[#allocation23] sm:$0xf] %v935_v17  ;;  %v836_v18 = vsel %vm665_vm4, %v833_v12, %v835_v16 }
 0x605   :  { %v837_v19 = vsel %vm667_vm5, %v834_v14, %v836_v18 }
 0x606   :  { %v838_v20 = vpack.c.b16 %v837_v19, %v837_v19 }
 0x608   :  { %1080 = vmatmul.mubr.msk.bf16.vlgmr.msra.gmra.mrb[8].mxu0 %vm248_vm1, %v838_v20 }
 0x609   :  { %1412 = shalt.err (!%p1409_p8)
}
 0x60a   :  { %s1413_s4 = scalar_lea.hbm %s1921_s15, 64 }
 0x60b   :  { %p1414_p9 = scmp.ne.s32.totalorder %s1921_s15, %s1413_s4  ;;  %p1417_p10 = scmp.lt.u32.totalorder %s1413_s4, %s1921_s15 }
 0x60d   :  { %p1419_p11 = pnand %p1417_p10, %p1414_p9 }
 0x60f   :  { %1422 = shalt.err (!%p1419_p11)
}
 0x610   :  { %956 = dma.vmem_to_hbm [thread:$0]  %s954_s8, 64, %s1921_s15, [#allocation22]  }
 0x611   :  { %s1503_s5 = smov [#allocation23]  }
 0x612   :  { %s963_s26 = sshll.u32 %s1503_s5, 4  ;;  %s964_s26 = int_to_ptr.vmem [resolvable:$true] %s963_s26 }
 0x613   :  { %s1423_s18 = scalar_lea.vmem %s964_s26, 64  ;;  %p1428_p13 = scmp.lt.s32.totalorder %s964_s26, %s964_s26 }
 0x614   :  { %p1424_p12 = scmp.ne.s32.totalorder %s964_s26, %s1423_s18  ;;  %p1429_p0 = scmp.lt.s32.totalorder %s1423_s18, %s1423_s18 }
 0x616   :  { %p1430_p1 = por %p1429_p0, %p1428_p13 }
 0x618   :  { %p1431_p2 = pnand %p1430_p1, %p1424_p12 }
 0x61a   :  { %1434 = shalt.err (!%p1431_p2)
}
 0x61b   :  { %s1435_s12 = scalar_lea.hbm %s1922_s16, 64 }
 0x61c   :  { %p1436_p3 = scmp.ne.s32.totalorder %s1922_s16, %s1435_s12  ;;  %p1439_p4 = scmp.lt.u32.totalorder %s1435_s12, %s1922_s16 }
 0x61e   :  { %p1441_p5 = pnand %p1439_p4, %p1436_p3 }
 0x620   :  { %1444 = shalt.err (!%p1441_p5)
}
 0x621   :  { %966 = dma.vmem_to_hbm [thread:$0]  %s964_s26, 64, %s1922_s16, [#allocation22]   ;;  %v1022_v24 = vld [vmem:[%s1919_s13] ss:$0 sm:$0xff] }
 0x622   :  { %s1504_s23 = smov [#allocation20]  }
 0x623   :  { %s943_s6 = sshll.u32 %s1504_s23, 4  ;;  %s944_s6 = int_to_ptr.vmem [resolvable:$true] %s943_s6 }
 0x624   :  { %s1445_s10 = scalar_lea.vmem %s944_s6, 64  ;;  %p1450_p7 = scmp.lt.s32.totalorder %s944_s6, %s944_s6 }
 0x625   :  { %p1446_p6 = scmp.ne.s32.totalorder %s944_s6, %s1445_s10  ;;  %p1451_p8 = scmp.lt.s32.totalorder %s1445_s10, %s1445_s10 }
 0x627   :  { %p1452_p9 = por %p1451_p8, %p1450_p7 }
 0x629   :  { %p1453_p10 = pnand %p1452_p9, %p1446_p6 }
 0x6db   :  { %v900_v23 = vpop.f32.mrb[8].mxu0 }
 0x6dc   :  { %v901_v25 = vadd.f32 %v900_v23, %v1802_v21  ;;  %v1081_v26 = vpop.f32.mrb[9].mxu0 }
 0x6dd   :  { %v903_v27 = vpop.f32.mrb[10].mxu0 }
 0x6de   :  { %v913_v43 = vadd.f32 %v1022_v24, %v901_v25  ;;  %v1082_v33 = vpop.f32.mrb[11].mxu0 }
 0x6e0   :  { %914 = vst [vmem:[#allocation20] sm:$0xf] %v913_v43 }
 0x6e1   :  { %1456 = shalt.err (!%p1453_p10)
}
 0x6e2   :  { %s1457_s13 = scalar_lea.hbm %s1920_s14, 64 }
 0x6e3   :  { %p1458_p11 = scmp.ne.s32.totalorder %s1920_s14, %s1457_s13  ;;  %p1461_p12 = scmp.lt.u32.totalorder %s1457_s13, %s1920_s14 }
 0x6e5   :  { %p1463_p13 = pnand %p1461_p12, %p1458_p11 }
 0x6e7   :  { %1466 = shalt.err (!%p1463_p13)
}
 0x6e8   :  { %946 = dma.vmem_to_hbm [thread:$0]  %s944_s6, 64, %s1920_s14, [#allocation4]  }
 0x6e9   :  { %1479 = dma.done.wait [#allocation4], 64  }
 0x6ea   :  { %1480 = vsyncadd [#allocation4], 4294967232 }
 0x6eb   :  { %1481 = dma.done.wait [#allocation22], 128  }
 0x6ec   :  { %1482 = vsyncadd [#allocation22], 4294967168 }
 0x6ed   :  { %976 = vsyncpa [#allocation3], 1 }
 0x6ee   :  { %977 = vsyncpa [#allocation6], 1 }
 0x6ef   :  { %978 = vsyncpa [#allocation9], 1 }
 0x6f0   :  { %979 = vsyncpa [#allocation12], 1 }
 0x6f1   :  { %980 = vsyncpa [#allocation15], 1 }
 0x6f2   :  { %981 = vsyncpa [#allocation18], 1 }
 0x6f3   :  { %982 = vsyncpa [#allocation4], 1 }
 0x6f4   :  { %983 = vsyncpa [#allocation22], 1 }

</bundles_post_ra>
